<compile_context>
chip_gen: v5e
topology: v5e:2x2
jax: 0.10.0
libtpu: 0.0.40
codegen_flags: <defaults>
</compile_context>

<pallas_src>
import functools

import jax
import jax.numpy as jnp
from jax import lax
from jax.experimental import pallas as pl
from jax.experimental.pallas import tpu as pltpu

ALPHA = 1.0
GAMMA = 2.0            # specialised: (1 - pt)**2 computed as an explicit square
LANE = 128
SUBLANE = 8
CHUNK_R = 512          # rows per in-kernel accumulation chunk (512*128*4B = 256 KiB f32)
MAX_TILE_R = 8192      # 8192*128*4B = 4 MiB per f32 input block
TARGET_BLOCKS = 4      # keep >= 4 grid blocks on large arrays (v7x megacore)


def _round_up(x, m):
    return -(-x // m) * m


def _bce_partial_kernel(p_ref, t_ref, out_ref, *, tile_r, chunk_r, valid_n,
                        need_mask, hard_labels):
    """Per-block partial BCE sums, written as one lane/sublane-dense (8,128) f32 tile."""
    num_chunks = tile_r // chunk_r
    block_row0 = pl.program_id(0) * tile_r

    def chunk_sum(c, acc):
        if num_chunks > 1:
            r0 = pl.multiple_of(c * chunk_r, chunk_r)
        else:
            r0 = 0
        p = p_ref[pl.ds(r0, chunk_r), :].astype(jnp.float32)
        t = t_ref[pl.ds(r0, chunk_r), :].astype(jnp.float32)

        # PyTorch binary_cross_entropy clamps each log term at -100.
        if hard_labels:
            # One transcendental / element (valid only for targets in {0, 1}).
            pt = t * p + (1.0 - t) * (1.0 - p)
            bce = -jnp.maximum(jnp.log(pt), jnp.float32(-100.0))
        else:
            # Two-log path keeps soft (non 0/1) targets exact.
            # NOTE: jnp.log(1 - p) (not log1p) intentionally mirrors PyTorch BCE.
            log_p = jnp.maximum(jnp.log(p), jnp.float32(-100.0))
            log_1mp = jnp.maximum(jnp.log(1.0 - p), jnp.float32(-100.0))
            bce = -(t * log_p + (1.0 - t) * log_1mp)

        if need_mask:
            # Mask out-of-range elements (padded last block / sub-lane tail).
            row_ids = lax.broadcasted_iota(jnp.int32, (chunk_r, LANE), 0)
            lane_ids = lax.broadcasted_iota(jnp.int32, (chunk_r, LANE), 1)
            flat_ids = (block_row0 + r0 + row_ids) * LANE + lane_ids
            bce = jnp.where(flat_ids < valid_n, bce, jnp.float32(0.0))

        # Leading-dim reshape-reduce: pure elementwise vreg adds on the VPU;
        # the single cross-lane/sublane reduction happens once, outside the kernel.
        return acc + bce.reshape(chunk_r // SUBLANE, SUBLANE, LANE).sum(axis=0)

    acc0 = jnp.zeros((SUBLANE, LANE), jnp.float32)
    if num_chunks == 1:
        acc = chunk_sum(0, acc0)
    else:
        acc = lax.fori_loop(0, num_chunks, chunk_sum, acc0,
                            unroll=min(num_chunks, 4))
    out_ref[...] = acc


def _choose_tiling(rows):
    """Returns (tile_r, chunk_r); tile_r is a multiple of chunk_r, chunk_r of 8."""
    rows8 = _round_up(rows, SUBLANE)
    if rows8 <= CHUNK_R:
        return rows8, rows8                      # one block, one straight-line chunk
    tile_r = _round_up(-(-rows8 // TARGET_BLOCKS), CHUNK_R)
    tile_r = max(CHUNK_R, min(MAX_TILE_R, tile_r))
    return tile_r, CHUNK_R


@functools.partial(jax.jit, static_argnames=("hard_labels",))
def focal_loss(inputs, targets, hard_labels=False):
    """inputs, targets: identically shaped arrays (probabilities / labels).

    Pass bf16 probabilities / int8 (or bool) targets directly for ~2.5x less HBM
    traffic — the kernel casts to f32 internally; do NOT astype in the caller.
    """
    n = inputs.size
    p = inputs.reshape(-1)
    t = targets.reshape(-1)

    rows = -(-n // LANE)                     # ceil(n / 128)
    lane_pad = rows * LANE - n
    if lane_pad:
        # TODO(synk): non-128-aligned element counts still take a padded-copy path
        # (extra HBM pass); the padded tail is excluded by the in-kernel mask.
        p = jnp.concatenate([p, jnp.full((lane_pad,), 0.5, p.dtype)])
        t = jnp.concatenate([t, jnp.zeros((lane_pad,), t.dtype)])

    p2d = p.reshape(rows, LANE)              # free reshape when n % 128 == 0
    t2d = t.reshape(rows, LANE)

    tile_r, chunk_r = _choose_tiling(rows)
    num_blocks = -(-rows // tile_r)          # uneven grid allowed; mask handles tail
    need_mask = (num_blocks * tile_r * LANE) != n

    kernel = functools.partial(
        _bce_partial_kernel, tile_r=tile_r, chunk_r=chunk_r, valid_n=n,
        need_mask=need_mask, hard_labels=hard_labels)

    in_bytes = p2d.size * p2d.dtype.itemsize + t2d.size * t2d.dtype.itemsize
    out_bytes = num_blocks * SUBLANE * LANE * 4
    n_transc = (1 if hard_labels else 2) * n

    # 2 inputs x 2 pipeline buffers x tile, plus headroom; safe on v5e/v6e/v7x.
    vmem_limit = 2 * tile_r * LANE * (p2d.dtype.itemsize + t2d.dtype.itemsize) + (8 << 20)
    vmem_limit = int(min(max(vmem_limit, 16 << 20), 48 << 20))

    partials = pl.pallas_call(
        kernel,
        out_shape=jax.ShapeDtypeStruct((num_blocks * SUBLANE, LANE), jnp.float32),
        grid_spec=pltpu.PrefetchScalarGridSpec(
            num_scalar_prefetch=0,
            grid=(num_blocks,),
            in_specs=[
                pl.BlockSpec((tile_r, LANE), lambda i: (i, 0)),
                pl.BlockSpec((tile_r, LANE), lambda i: (i, 0)),
            ],
            out_specs=pl.BlockSpec((SUBLANE, LANE), lambda i: (i, 0)),
        ),
        compiler_params=pltpu.CompilerParams(
            dimension_semantics=("parallel",),   # independent blocks -> megacore on v7x
            vmem_limit_bytes=vmem_limit,
        ),
        cost_estimate=pl.CostEstimate(
            flops=6 * n,
            transcendentals=n_transc,
            bytes_accessed=in_bytes + out_bytes,
        ),
    )(p2d, t2d)

    # Tiny scalar epilogue (fused by XLA under jit): exactly the PyTorch math.
    bce_mean = jnp.sum(partials) / jnp.float32(n)          # reduction='mean'
    pt = jnp.exp(-bce_mean)
    one_minus_pt = 1.0 - pt
    return jnp.float32(ALPHA) * one_minus_pt * one_minus_pt * bce_mean


def focal_loss_ref(inputs, targets):
    p = inputs.astype(jnp.float32)
    t = targets.astype(jnp.float32)
    log_p = jnp.maximum(jnp.log(p), -100.0)
    log_1mp = jnp.maximum(jnp.log(1.0 - p), -100.0)
    bce = jnp.mean(-(t * log_p + (1.0 - t) * log_1mp))
    pt = jnp.exp(-bce)
    return ALPHA * (1.0 - pt) ** GAMMA * bce


if __name__ == "__main__":
    key = jax.random.PRNGKey(0)
    k1, k2 = jax.random.split(key)
    # NCHW-shaped inputs, as produced by a sigmoid head (probabilities in (0,1)).
    shape = (2, 4, 16, 16)
    inputs = jax.nn.sigmoid(jax.random.normal(k1, shape, dtype=jnp.float32))
    targets = (jax.random.uniform(k2, shape) > 0.5).astype(jnp.float32)

    loss = focal_loss(inputs, targets)
    jax.block_until_ready(loss)

    ref = focal_loss_ref(inputs, targets)
    assert jnp.allclose(loss, ref, rtol=1e-5, atol=1e-6), (loss, ref)
    print("KERNEL_OK")
</pallas_src>

<mosaic_0001>
module attributes {stable_mosaic.version = 11 : i64} {
  func.func @_bce_partial_kernel(%arg0: i32, %arg1: memref<16x128xf32, #tpu.memory_space<vmem>>, %arg2: memref<16x128xf32, #tpu.memory_space<vmem>>, %arg3: memref<8x128xf32, #tpu.memory_space<vmem>>) attributes {dimension_semantics = [#tpu.dimension_semantics<parallel>], iteration_bounds = array<i64: 1>, scalar_prefetch = 0 : i64, scratch_operands = 0 : i64, tpu.core_type = #tpu.core_type<tc>, window_params = [{transform_indices = @transform_0, window_bounds = array<i64: 16, 128>}, {transform_indices = @transform_1, window_bounds = array<i64: 16, 128>}, {transform_indices = @transform_2, window_bounds = array<i64: 8, 128>}]} {
    %cst = arith.constant 0.000000e+00 : f32
    %0 = vector.broadcast %cst : f32 to vector<8x128xf32>
    %c0 = arith.constant 0 : index
    %c0_0 = arith.constant 0 : index
    %1 = vector.load %arg1[%c0, %c0_0] : memref<16x128xf32, #tpu.memory_space<vmem>>, vector<16x128xf32>
    %c0_1 = arith.constant 0 : index
    %c0_2 = arith.constant 0 : index
    %2 = vector.load %arg2[%c0_1, %c0_2] : memref<16x128xf32, #tpu.memory_space<vmem>>, vector<16x128xf32>
    %3 = math.log %1 : vector<16x128xf32>
    %cst_3 = arith.constant -1.000000e+02 : f32
    %4 = vector.broadcast %cst_3 : f32 to vector<16x128xf32>
    %5 = arith.maximumf %3, %4 : vector<16x128xf32>
    %cst_4 = arith.constant 1.000000e+00 : f32
    %6 = vector.broadcast %cst_4 : f32 to vector<16x128xf32>
    %7 = arith.subf %6, %1 : vector<16x128xf32>
    %8 = math.log %7 : vector<16x128xf32>
    %cst_5 = arith.constant -1.000000e+02 : f32
    %9 = vector.broadcast %cst_5 : f32 to vector<16x128xf32>
    %10 = arith.maximumf %8, %9 : vector<16x128xf32>
    %11 = arith.mulf %2, %5 : vector<16x128xf32>
    %cst_6 = arith.constant 1.000000e+00 : f32
    %12 = vector.broadcast %cst_6 : f32 to vector<16x128xf32>
    %13 = arith.subf %12, %2 : vector<16x128xf32>
    %14 = arith.mulf %13, %10 : vector<16x128xf32>
    %15 = arith.addf %11, %14 : vector<16x128xf32>
    %cst_7 = arith.constant 0.000000e+00 : f32
    %16 = vector.broadcast %cst_7 : f32 to vector<16x128xf32>
    %17 = arith.subf %16, %15 : vector<16x128xf32>
    %18 = vector.shape_cast %17 : vector<16x128xf32> to vector<2x8x128xf32>
    %cst_8 = arith.constant dense<0.000000e+00> : vector<8x128xf32>
    %19 = vector.multi_reduction <add>, %18, %cst_8 [0] : vector<2x8x128xf32> to vector<8x128xf32>
    %20 = arith.addf %0, %19 : vector<8x128xf32>
    %c0_9 = arith.constant 0 : index
    %c0_10 = arith.constant 0 : index
    %21 = vector.load %arg3[%c0_9, %c0_10] : memref<8x128xf32, #tpu.memory_space<vmem>>, vector<8x128xf32>
    tpu.vector_store %arg3[%c0_9, %c0_10], %20 {strides = array<i32>} : memref<8x128xf32, #tpu.memory_space<vmem>>, vector<8x128xf32>,
    return
  }
  func.func @transform_0(%arg0: i32) -> (i32, i32) {
    %c0_i32 = arith.constant 0 : i32
    %c0_i32_0 = arith.constant 0 : i32
    return %arg0, %c0_i32 : i32, i32
  }
  func.func @transform_1(%arg0: i32) -> (i32, i32) {
    %c0_i32 = arith.constant 0 : i32
    %c0_i32_0 = arith.constant 0 : i32
    return %arg0, %c0_i32 : i32, i32
  }
  func.func @transform_2(%arg0: i32) -> (i32, i32) {
    %c0_i32 = arith.constant 0 : i32
    %c0_i32_0 = arith.constant 0 : i32
    return %arg0, %c0_i32 : i32, i32
  }
}

</mosaic_0001>

<bundles_post_ra>
// kernel: focal_loss.1
= control target key start
LH: loop header
LB: loop body
LE: loop exit
PB: predicated region body
PF: predicated region fallthrough
CT: control target
= control target key end

     0   :  { %s84_s0 = inlined_call_operand.vmem [shape: f32[16,128], index: 0, kind: input, shape index: {}]   ;;  %s85_s1 = inlined_call_operand.vmem [shape: f32[16,128], index: 1, kind: input, shape index: {}]   ;;  %s86_s2 = inlined_call_operand.vmem [shape: f32[8,128], index: 2, kind: output, shape index: {}]  }
   0x1   :  { %v11_v0 = vld [vmem:[%s84_s0] sm:$0xff]  ;;  %v12_v1 = vld [vmem:[%s84_s0 + $0x8] sm:$0xff] }
   0x2   :  { %46 = vlog2.f32 %v11_v0  ;;  %v21_v2 = vsub.f32 1.0, %v11_v0  ;;  %v22_v3 = vsub.f32 1.0, %v12_v1  ;;  %v13_v5 = vld [vmem:[%s85_s1] sm:$0xff]  ;;  %v14_v7 = vld [vmem:[%s85_s1 + $0x8] sm:$0xff] }
   0x3   :  { %48 = vlog2.f32 %v12_v1  ;;  %v31_v14 = vsub.f32 1.0, %v13_v5  ;;  %v32_v17 = vsub.f32 1.0, %v14_v7 }
   0x4   :  { %50 = vlog2.f32 %v21_v2 }
   0x5   :  { %52 = vlog2.f32 %v22_v3 }
   0x8   :  { %v47_v4 = vpop.eup %46 }
   0x9   :  { %v49_v6 = vpop.eup %48  ;;  %v16_v8 = vmul.f32 0.6931472, %v47_v4 }
   0xa   :  { %v51_v9 = vpop.eup %50  ;;  %v18_v10 = vmul.f32 0.6931472, %v49_v6 }
   0xb   :  { %v53_v11 = vpop.eup %52  ;;  %v19_v12 = vmax.f32 %v16_v8, -100.0  ;;  %v24_v13 = vmul.f32 0.6931472, %v51_v9 }
   0xc   :  { %v20_v15 = vmax.f32 %v18_v10, -100.0  ;;  %v26_v16 = vmul.f32 0.6931472, %v53_v11 }
   0xd   :  { %v27_v18 = vmax.f32 %v24_v13, -100.0  ;;  %v29_v19 = vmul.f32 %v19_v12, %v13_v5 }
   0xe   :  { %v28_v20 = vmax.f32 %v26_v16, -100.0  ;;  %v30_v21 = vmul.f32 %v20_v15, %v14_v7 }
   0xf   :  { %v33_v22 = vmul.f32 %v31_v14, %v27_v18 }
  0x10   :  { %v34_v23 = vmul.f32 %v32_v17, %v28_v20 }
  0x11   :  { %v35_v24 = vadd.f32 %v33_v22, %v29_v19 }
  0x12   :  { %v36_v25 = vadd.f32 %v34_v23, %v30_v21 }
  0x13   :  { %v37_v26 = vsub.f32 0.0, %v35_v24 }
  0x14   :  { %v38_v27 = vsub.f32 0.0, %v36_v25 }
  0x16   :  { %v39_v28 = vadd.f32 %v38_v27, %v37_v26 }
  0x18   :  { %41 = vst [vmem:[%s86_s2] sm:$0xff] %v39_v28 }

</bundles_post_ra>
